<compile_context>
chip_gen: v7x
topology: tpu7x:2x2x1
jax: 0.10.0
libtpu: 0.0.40
codegen_flags: <defaults>
</compile_context>

<pallas_src>
import jax
import jax.numpy as jnp
from jax.experimental import pallas as pl
from jax.experimental.pallas import tpu as pltpu

HIDDEN = 64
INPUT = 64
GATES = 4 * HIDDEN


def lstm_kernel(x_ref, wih_ref, whh_ref, b_ref, out_ref):
    # x_ref:   (T*B, 64)  time-major flattened sequence (step t = rows t*B:(t+1)*B)
    # wih_ref: (64, 256)  W_ih^T, gate columns reordered to [i, f, o, g]
    # whh_ref: (64, 256)  W_hh^T, same column order
    # b_ref:   (1, 256)   b_ih + b_hh, same column order
    # out_ref: (B, 64)    final hidden state h_T
    TB = x_ref.shape[0]
    B = out_ref.shape[0]
    T = TB // B

    # Loop-invariant Ref reads hoisted once into vregs (Ref reads are not CSE'd).
    wih = wih_ref[...]
    whh = whh_ref[...]
    bias = b_ref[...]

    # Hoisted input projection: one clamp pass + one MXU dot for ALL timesteps.
    # gx stays a value (no VMEM scratch round trip on the serial critical path).
    x_all = jnp.maximum(x_ref[...], 1e-7)  # torch.clamp(min=1e-7)
    gx = jnp.dot(x_all, wih, preferred_element_type=jnp.float32) + bias  # (T*B, 256)

    # Serial recurrence: one K=64 MXU dot per step; h/c carried in vregs.
    # TODO(synk): optionally hold W_hh^T resident in the MXU via matmul_push_rhs (v5e).
    h = jnp.zeros((B, HIDDEN), jnp.float32)
    c = jnp.zeros((B, HIDDEN), jnp.float32)
    for t in range(T):  # T is small and static -> fully unrolled
        gates = gx[t * B:(t + 1) * B, :] + jnp.dot(
            h, whh, preferred_element_type=jnp.float32
        )
        # Gate columns are pre-ordered [i, f, o, g]: one contiguous sigmoid over
        # the first 3*HIDDEN lanes, one tanh over the last HIDDEN lanes.
        sig = jax.nn.sigmoid(gates[:, : 3 * HIDDEN])
        i_g = sig[:, 0 * HIDDEN:1 * HIDDEN]
        f_g = sig[:, 1 * HIDDEN:2 * HIDDEN]
        o_g = sig[:, 2 * HIDDEN:3 * HIDDEN]
        g_g = jnp.tanh(gates[:, 3 * HIDDEN:])
        c = f_g * c + i_g * g_g
        h = o_g * jnp.tanh(c)

    # F.dropout(p=0.3) is a no-op in eval mode.
    # TODO(synk): training-mode dropout not implemented.
    out_ref[...] = h.astype(out_ref.dtype)


def my_lstm_forward(x, adj, params):
    """x: (B, C, H, W) with H*W == 64. adj is unused (matches reference forward)."""
    del adj
    B, C, H, W = x.shape
    assert H * W == INPUT
    T = C

    # Time-major flatten (T*B, 64): tiny transpose done by XLA outside the kernel,
    # so every per-step gx slice inside the kernel is a contiguous row block.
    seq = jnp.transpose(x.reshape(B, T, H * W), (1, 0, 2)).reshape(T * B, INPUT)
    seq = seq.astype(jnp.float32)

    # PyTorch gate order is [i, f, g, o] along the 4*H rows of w_ih/w_hh.
    # Reorder to [i, f, o, g] at trace time (free) so sigmoid/tanh each act on
    # one contiguous lane range in the kernel.
    perm = jnp.concatenate([
        jnp.arange(0, HIDDEN),                 # i
        jnp.arange(HIDDEN, 2 * HIDDEN),        # f
        jnp.arange(3 * HIDDEN, GATES),         # o
        jnp.arange(2 * HIDDEN, 3 * HIDDEN),    # g
    ])
    wih_t = params["w_ih"][perm, :].T                              # (64, 256)
    whh_t = params["w_hh"][perm, :].T                              # (64, 256)
    bias = (params["b_ih"] + params["b_hh"])[perm].reshape(1, GATES)

    h_last = pl.pallas_call(
        lstm_kernel,
        out_shape=jax.ShapeDtypeStruct((B, HIDDEN), jnp.float32),
        grid_spec=pltpu.PrefetchScalarGridSpec(
            num_scalar_prefetch=0,
            grid=(1,),                  # single invocation: whole LSTM runs in-kernel
            in_specs=[
                pl.BlockSpec((T * B, INPUT), lambda i: (0, 0)),
                pl.BlockSpec((INPUT, GATES), lambda i: (0, 0)),
                pl.BlockSpec((HIDDEN, GATES), lambda i: (0, 0)),
                pl.BlockSpec((1, GATES), lambda i: (0, 0)),
            ],
            out_specs=pl.BlockSpec((B, HIDDEN), lambda i: (0, 0)),
        ),
        compiler_params=pltpu.CompilerParams(
            dimension_semantics=("arbitrary",)
        ),
    )(seq, wih_t, whh_t, bias)

    # output[:, -1, :].squeeze().view(B, 8, 8)
    return h_last.reshape(B, 8, 8)


def init_params(key):
    # Deterministic init matching PyTorch LSTM parameter shapes
    # (uniform(-1/sqrt(hidden), 1/sqrt(hidden))), gate row order [i, f, g, o].
    k1, k2, k3, k4 = jax.random.split(key, 4)
    bound = 1.0 / jnp.sqrt(HIDDEN)
    return {
        "w_ih": jax.random.uniform(k1, (GATES, INPUT), jnp.float32, -bound, bound),
        "w_hh": jax.random.uniform(k2, (GATES, HIDDEN), jnp.float32, -bound, bound),
        "b_ih": jax.random.uniform(k3, (GATES,), jnp.float32, -bound, bound),
        "b_hh": jax.random.uniform(k4, (GATES,), jnp.float32, -bound, bound),
    }


if __name__ == "__main__":
    key = jax.random.PRNGKey(0)
    kx, ka, kp = jax.random.split(key, 3)

    B, C, H, W = 2, 8, 8, 8          # seq_len = C = 8, input_size = H*W = 64
    x = jax.random.normal(kx, (B, C, H, W), dtype=jnp.float32)
    adj = jax.random.normal(ka, (B, 8, 8), dtype=jnp.float32)  # unused, matches signature

    params = init_params(kp)

    out = my_lstm_forward(x, adj, params)
    jax.block_until_ready(out)
    assert out.shape == (B, 8, 8)
    print("KERNEL_OK")
</pallas_src>

<mosaic_0001>
module attributes {stable_mosaic.version = 11 : i64} {
  func.func @lstm_kernel(%arg0: i32, %arg1: memref<16x64xf32, #tpu.memory_space<vmem>>, %arg2: memref<64x256xf32, #tpu.memory_space<vmem>>, %arg3: memref<64x256xf32, #tpu.memory_space<vmem>>, %arg4: memref<1x256xf32, #tpu.memory_space<vmem>>, %arg5: memref<2x64xf32, #tpu.memory_space<vmem>>) attributes {dimension_semantics = [#tpu.dimension_semantics<arbitrary>], iteration_bounds = array<i64: 1>, scalar_prefetch = 0 : i64, scratch_operands = 0 : i64, tpu.core_type = #tpu.core_type<tc>, window_params = [{pipeline_mode = #tpu.pipeline_mode<synchronous>, transform_indices = @transform_0, window_bounds = array<i64: 16, 64>}, {pipeline_mode = #tpu.pipeline_mode<synchronous>, transform_indices = @transform_1, window_bounds = array<i64: 64, 256>}, {pipeline_mode = #tpu.pipeline_mode<synchronous>, transform_indices = @transform_2, window_bounds = array<i64: 64, 256>}, {pipeline_mode = #tpu.pipeline_mode<synchronous>, transform_indices = @transform_3, window_bounds = array<i64: 1, 256>}, {pipeline_mode = #tpu.pipeline_mode<synchronous>, transform_indices = @transform_4, window_bounds = array<i64: 2, 64>}]} {
    %c0 = arith.constant 0 : index
    %c0_0 = arith.constant 0 : index
    %0 = vector.load %arg2[%c0, %c0_0] : memref<64x256xf32, #tpu.memory_space<vmem>>, vector<64x256xf32>
    %c0_1 = arith.constant 0 : index
    %c0_2 = arith.constant 0 : index
    %1 = vector.load %arg3[%c0_1, %c0_2] : memref<64x256xf32, #tpu.memory_space<vmem>>, vector<64x256xf32>
    %c0_3 = arith.constant 0 : index
    %c0_4 = arith.constant 0 : index
    %2 = vector.load %arg4[%c0_3, %c0_4] : memref<1x256xf32, #tpu.memory_space<vmem>>, vector<1x256xf32>
    %c0_5 = arith.constant 0 : index
    %c0_6 = arith.constant 0 : index
    %3 = vector.load %arg1[%c0_5, %c0_6] : memref<16x64xf32, #tpu.memory_space<vmem>>, vector<16x64xf32>
    %cst = arith.constant 1.000000e-07 : f32
    %4 = vector.broadcast %cst : f32 to vector<16x64xf32>
    %5 = arith.maximumf %3, %4 : vector<16x64xf32>
    %cst_7 = arith.constant dense<0.000000e+00> : vector<16x256xf32>
    %6 = tpu.matmul %5, %0, %cst_7 {dimension_numbers = #tpu.dot_dimension_numbers<[1], [0], [0], [1], [0, 0, 1, 1], [], []>} : vector<16x64xf32>, vector<64x256xf32>, vector<16x256xf32> -> vector<16x256xf32>
    %7 = vector.broadcast %2 : vector<1x256xf32> to vector<16x256xf32>
    %8 = arith.addf %6, %7 : vector<16x256xf32>
    %cst_8 = arith.constant 0.000000e+00 : f32
    %9 = vector.broadcast %cst_8 : f32 to vector<2x64xf32>
    %cst_9 = arith.constant 0.000000e+00 : f32
    %10 = vector.broadcast %cst_9 : f32 to vector<2x64xf32>
    %11 = vector.extract_strided_slice %8 {offsets = [0, 0], sizes = [2, 256], strides = [1, 1]} : vector<16x256xf32> to vector<2x256xf32>
    %cst_10 = arith.constant dense<0.000000e+00> : vector<2x256xf32>
    %12 = tpu.matmul %9, %1, %cst_10 {dimension_numbers = #tpu.dot_dimension_numbers<[1], [0], [0], [1], [0, 0, 1, 1], [], []>} : vector<2x64xf32>, vector<64x256xf32>, vector<2x256xf32> -> vector<2x256xf32>
    %13 = arith.addf %11, %12 : vector<2x256xf32>
    %14 = vector.extract_strided_slice %13 {offsets = [0, 0], sizes = [2, 192], strides = [1, 1]} : vector<2x256xf32> to vector<2x192xf32>
    %15 = arith.negf %14 : vector<2x192xf32>
    %16 = math.exp %15 : vector<2x192xf32>
    %cst_11 = arith.constant 1.000000e+00 : f32
    %17 = vector.broadcast %cst_11 : f32 to vector<2x192xf32>
    %18 = arith.addf %17, %16 : vector<2x192xf32>
    %19 = arith.divf %17, %18 : vector<2x192xf32>
    %20 = vector.extract_strided_slice %19 {offsets = [0, 0], sizes = [2, 64], strides = [1, 1]} : vector<2x192xf32> to vector<2x64xf32>
    %21 = vector.extract_strided_slice %19 {offsets = [0, 64], sizes = [2, 64], strides = [1, 1]} : vector<2x192xf32> to vector<2x64xf32>
    %22 = vector.extract_strided_slice %19 {offsets = [0, 128], sizes = [2, 64], strides = [1, 1]} : vector<2x192xf32> to vector<2x64xf32>
    %23 = vector.extract_strided_slice %13 {offsets = [0, 192], sizes = [2, 64], strides = [1, 1]} : vector<2x256xf32> to vector<2x64xf32>
    %24 = math.tanh %23 : vector<2x64xf32>
    %25 = arith.mulf %21, %10 : vector<2x64xf32>
    %26 = arith.mulf %20, %24 : vector<2x64xf32>
    %27 = arith.addf %25, %26 : vector<2x64xf32>
    %28 = math.tanh %27 : vector<2x64xf32>
    %29 = arith.mulf %22, %28 : vector<2x64xf32>
    %30 = vector.extract_strided_slice %8 {offsets = [2, 0], sizes = [2, 256], strides = [1, 1]} : vector<16x256xf32> to vector<2x256xf32>
    %cst_12 = arith.constant dense<0.000000e+00> : vector<2x256xf32>
    %31 = tpu.matmul %29, %1, %cst_12 {dimension_numbers = #tpu.dot_dimension_numbers<[1], [0], [0], [1], [0, 0, 1, 1], [], []>} : vector<2x64xf32>, vector<64x256xf32>, vector<2x256xf32> -> vector<2x256xf32>
    %32 = arith.addf %30, %31 : vector<2x256xf32>
    %33 = vector.extract_strided_slice %32 {offsets = [0, 0], sizes = [2, 192], strides = [1, 1]} : vector<2x256xf32> to vector<2x192xf32>
    %34 = arith.negf %33 : vector<2x192xf32>
    %35 = math.exp %34 : vector<2x192xf32>
    %cst_13 = arith.constant 1.000000e+00 : f32
    %36 = vector.broadcast %cst_13 : f32 to vector<2x192xf32>
    %37 = arith.addf %36, %35 : vector<2x192xf32>
    %38 = arith.divf %36, %37 : vector<2x192xf32>
    %39 = vector.extract_strided_slice %38 {offsets = [0, 0], sizes = [2, 64], strides = [1, 1]} : vector<2x192xf32> to vector<2x64xf32>
    %40 = vector.extract_strided_slice %38 {offsets = [0, 64], sizes = [2, 64], strides = [1, 1]} : vector<2x192xf32> to vector<2x64xf32>
    %41 = vector.extract_strided_slice %38 {offsets = [0, 128], sizes = [2, 64], strides = [1, 1]} : vector<2x192xf32> to vector<2x64xf32>
    %42 = vector.extract_strided_slice %32 {offsets = [0, 192], sizes = [2, 64], strides = [1, 1]} : vector<2x256xf32> to vector<2x64xf32>
    %43 = math.tanh %42 : vector<2x64xf32>
    %44 = arith.mulf %40, %27 : vector<2x64xf32>
    %45 = arith.mulf %39, %43 : vector<2x64xf32>
    %46 = arith.addf %44, %45 : vector<2x64xf32>
    %47 = math.tanh %46 : vector<2x64xf32>
    %48 = arith.mulf %41, %47 : vector<2x64xf32>
    %49 = vector.extract_strided_slice %8 {offsets = [4, 0], sizes = [2, 256], strides = [1, 1]} : vector<16x256xf32> to vector<2x256xf32>
    %cst_14 = arith.constant dense<0.000000e+00> : vector<2x256xf32>
    %50 = tpu.matmul %48, %1, %cst_14 {dimension_numbers = #tpu.dot_dimension_numbers<[1], [0], [0], [1], [0, 0, 1, 1], [], []>} : vector<2x64xf32>, vector<64x256xf32>, vector<2x256xf32> -> vector<2x256xf32>
    %51 = arith.addf %49, %50 : vector<2x256xf32>
    %52 = vector.extract_strided_slice %51 {offsets = [0, 0], sizes = [2, 192], strides = [1, 1]} : vector<2x256xf32> to vector<2x192xf32>
    %53 = arith.negf %52 : vector<2x192xf32>
    %54 = math.exp %53 : vector<2x192xf32>
    %cst_15 = arith.constant 1.000000e+00 : f32
    %55 = vector.broadcast %cst_15 : f32 to vector<2x192xf32>
    %56 = arith.addf %55, %54 : vector<2x192xf32>
    %57 = arith.divf %55, %56 : vector<2x192xf32>
    %58 = vector.extract_strided_slice %57 {offsets = [0, 0], sizes = [2, 64], strides = [1, 1]} : vector<2x192xf32> to vector<2x64xf32>
    %59 = vector.extract_strided_slice %57 {offsets = [0, 64], sizes = [2, 64], strides = [1, 1]} : vector<2x192xf32> to vector<2x64xf32>
    %60 = vector.extract_strided_slice %57 {offsets = [0, 128], sizes = [2, 64], strides = [1, 1]} : vector<2x192xf32> to vector<2x64xf32>
    %61 = vector.extract_strided_slice %51 {offsets = [0, 192], sizes = [2, 64], strides = [1, 1]} : vector<2x256xf32> to vector<2x64xf32>
    %62 = math.tanh %61 : vector<2x64xf32>
    %63 = arith.mulf %59, %46 : vector<2x64xf32>
    %64 = arith.mulf %58, %62 : vector<2x64xf32>
    %65 = arith.addf %63, %64 : vector<2x64xf32>
    %66 = math.tanh %65 : vector<2x64xf32>
    %67 = arith.mulf %60, %66 : vector<2x64xf32>
    %68 = vector.extract_strided_slice %8 {offsets = [6, 0], sizes = [2, 256], strides = [1, 1]} : vector<16x256xf32> to vector<2x256xf32>
    %cst_16 = arith.constant dense<0.000000e+00> : vector<2x256xf32>
    %69 = tpu.matmul %67, %1, %cst_16 {dimension_numbers = #tpu.dot_dimension_numbers<[1], [0], [0], [1], [0, 0, 1, 1], [], []>} : vector<2x64xf32>, vector<64x256xf32>, vector<2x256xf32> -> vector<2x256xf32>
    %70 = arith.addf %68, %69 : vector<2x256xf32>
    %71 = vector.extract_strided_slice %70 {offsets = [0, 0], sizes = [2, 192], strides = [1, 1]} : vector<2x256xf32> to vector<2x192xf32>
    %72 = arith.negf %71 : vector<2x192xf32>
    %73 = math.exp %72 : vector<2x192xf32>
    %cst_17 = arith.constant 1.000000e+00 : f32
    %74 = vector.broadcast %cst_17 : f32 to vector<2x192xf32>
    %75 = arith.addf %74, %73 : vector<2x192xf32>
    %76 = arith.divf %74, %75 : vector<2x192xf32>
    %77 = vector.extract_strided_slice %76 {offsets = [0, 0], sizes = [2, 64], strides = [1, 1]} : vector<2x192xf32> to vector<2x64xf32>
    %78 = vector.extract_strided_slice %76 {offsets = [0, 64], sizes = [2, 64], strides = [1, 1]} : vector<2x192xf32> to vector<2x64xf32>
    %79 = vector.extract_strided_slice %76 {offsets = [0, 128], sizes = [2, 64], strides = [1, 1]} : vector<2x192xf32> to vector<2x64xf32>
    %80 = vector.extract_strided_slice %70 {offsets = [0, 192], sizes = [2, 64], strides = [1, 1]} : vector<2x256xf32> to vector<2x64xf32>
    %81 = math.tanh %80 : vector<2x64xf32>
    %82 = arith.mulf %78, %65 : vector<2x64xf32>
    %83 = arith.mulf %77, %81 : vector<2x64xf32>
    %84 = arith.addf %82, %83 : vector<2x64xf32>
    %85 = math.tanh %84 : vector<2x64xf32>
    %86 = arith.mulf %79, %85 : vector<2x64xf32>
    %87 = vector.extract_strided_slice %8 {offsets = [8, 0], sizes = [2, 256], strides = [1, 1]} : vector<16x256xf32> to vector<2x256xf32>
    %cst_18 = arith.constant dense<0.000000e+00> : vector<2x256xf32>
    %88 = tpu.matmul %86, %1, %cst_18 {dimension_numbers = #tpu.dot_dimension_numbers<[1], [0], [0], [1], [0, 0, 1, 1], [], []>} : vector<2x64xf32>, vector<64x256xf32>, vector<2x256xf32> -> vector<2x256xf32>
    %89 = arith.addf %87, %88 : vector<2x256xf32>
    %90 = vector.extract_strided_slice %89 {offsets = [0, 0], sizes = [2, 192], strides = [1, 1]} : vector<2x256xf32> to vector<2x192xf32>
    %91 = arith.negf %90 : vector<2x192xf32>
    %92 = math.exp %91 : vector<2x192xf32>
    %cst_19 = arith.constant 1.000000e+00 : f32
    %93 = vector.broadcast %cst_19 : f32 to vector<2x192xf32>
    %94 = arith.addf %93, %92 : vector<2x192xf32>
    %95 = arith.divf %93, %94 : vector<2x192xf32>
    %96 = vector.extract_strided_slice %95 {offsets = [0, 0], sizes = [2, 64], strides = [1, 1]} : vector<2x192xf32> to vector<2x64xf32>
    %97 = vector.extract_strided_slice %95 {offsets = [0, 64], sizes = [2, 64], strides = [1, 1]} : vector<2x192xf32> to vector<2x64xf32>
    %98 = vector.extract_strided_slice %95 {offsets = [0, 128], sizes = [2, 64], strides = [1, 1]} : vector<2x192xf32> to vector<2x64xf32>
    %99 = vector.extract_strided_slice %89 {offsets = [0, 192], sizes = [2, 64], strides = [1, 1]} : vector<2x256xf32> to vector<2x64xf32>
    %100 = math.tanh %99 : vector<2x64xf32>
    %101 = arith.mulf %97, %84 : vector<2x64xf32>
    %102 = arith.mulf %96, %100 : vector<2x64xf32>
    %103 = arith.addf %101, %102 : vector<2x64xf32>
    %104 = math.tanh %103 : vector<2x64xf32>
    %105 = arith.mulf %98, %104 : vector<2x64xf32>
    %106 = vector.extract_strided_slice %8 {offsets = [10, 0], sizes = [2, 256], strides = [1, 1]} : vector<16x256xf32> to vector<2x256xf32>
    %cst_20 = arith.constant dense<0.000000e+00> : vector<2x256xf32>
    %107 = tpu.matmul %105, %1, %cst_20 {dimension_numbers = #tpu.dot_dimension_numbers<[1], [0], [0], [1], [0, 0, 1, 1], [], []>} : vector<2x64xf32>, vector<64x256xf32>, vector<2x256xf32> -> vector<2x256xf32>
    %108 = arith.addf %106, %107 : vector<2x256xf32>
    %109 = vector.extract_strided_slice %108 {offsets = [0, 0], sizes = [2, 192], strides = [1, 1]} : vector<2x256xf32> to vector<2x192xf32>
    %110 = arith.negf %109 : vector<2x192xf32>
    %111 = math.exp %110 : vector<2x192xf32>
    %cst_21 = arith.constant 1.000000e+00 : f32
    %112 = vector.broadcast %cst_21 : f32 to vector<2x192xf32>
    %113 = arith.addf %112, %111 : vector<2x192xf32>
    %114 = arith.divf %112, %113 : vector<2x192xf32>
    %115 = vector.extract_strided_slice %114 {offsets = [0, 0], sizes = [2, 64], strides = [1, 1]} : vector<2x192xf32> to vector<2x64xf32>
    %116 = vector.extract_strided_slice %114 {offsets = [0, 64], sizes = [2, 64], strides = [1, 1]} : vector<2x192xf32> to vector<2x64xf32>
    %117 = vector.extract_strided_slice %114 {offsets = [0, 128], sizes = [2, 64], strides = [1, 1]} : vector<2x192xf32> to vector<2x64xf32>
    %118 = vector.extract_strided_slice %108 {offsets = [0, 192], sizes = [2, 64], strides = [1, 1]} : vector<2x256xf32> to vector<2x64xf32>
    %119 = math.tanh %118 : vector<2x64xf32>
    %120 = arith.mulf %116, %103 : vector<2x64xf32>
    %121 = arith.mulf %115, %119 : vector<2x64xf32>
    %122 = arith.addf %120, %121 : vector<2x64xf32>
    %123 = math.tanh %122 : vector<2x64xf32>
    %124 = arith.mulf %117, %123 : vector<2x64xf32>
    %125 = vector.extract_strided_slice %8 {offsets = [12, 0], sizes = [2, 256], strides = [1, 1]} : vector<16x256xf32> to vector<2x256xf32>
    %cst_22 = arith.constant dense<0.000000e+00> : vector<2x256xf32>
    %126 = tpu.matmul %124, %1, %cst_22 {dimension_numbers = #tpu.dot_dimension_numbers<[1], [0], [0], [1], [0, 0, 1, 1], [], []>} : vector<2x64xf32>, vector<64x256xf32>, vector<2x256xf32> -> vector<2x256xf32>
    %127 = arith.addf %125, %126 : vector<2x256xf32>
    %128 = vector.extract_strided_slice %127 {offsets = [0, 0], sizes = [2, 192], strides = [1, 1]} : vector<2x256xf32> to vector<2x192xf32>
    %129 = arith.negf %128 : vector<2x192xf32>
    %130 = math.exp %129 : vector<2x192xf32>
    %cst_23 = arith.constant 1.000000e+00 : f32
    %131 = vector.broadcast %cst_23 : f32 to vector<2x192xf32>
    %132 = arith.addf %131, %130 : vector<2x192xf32>
    %133 = arith.divf %131, %132 : vector<2x192xf32>
    %134 = vector.extract_strided_slice %133 {offsets = [0, 0], sizes = [2, 64], strides = [1, 1]} : vector<2x192xf32> to vector<2x64xf32>
    %135 = vector.extract_strided_slice %133 {offsets = [0, 64], sizes = [2, 64], strides = [1, 1]} : vector<2x192xf32> to vector<2x64xf32>
    %136 = vector.extract_strided_slice %133 {offsets = [0, 128], sizes = [2, 64], strides = [1, 1]} : vector<2x192xf32> to vector<2x64xf32>
    %137 = vector.extract_strided_slice %127 {offsets = [0, 192], sizes = [2, 64], strides = [1, 1]} : vector<2x256xf32> to vector<2x64xf32>
    %138 = math.tanh %137 : vector<2x64xf32>
    %139 = arith.mulf %135, %122 : vector<2x64xf32>
    %140 = arith.mulf %134, %138 : vector<2x64xf32>
    %141 = arith.addf %139, %140 : vector<2x64xf32>
    %142 = math.tanh %141 : vector<2x64xf32>
    %143 = arith.mulf %136, %142 : vector<2x64xf32>
    %144 = vector.extract_strided_slice %8 {offsets = [14, 0], sizes = [2, 256], strides = [1, 1]} : vector<16x256xf32> to vector<2x256xf32>
    %cst_24 = arith.constant dense<0.000000e+00> : vector<2x256xf32>
    %145 = tpu.matmul %143, %1, %cst_24 {dimension_numbers = #tpu.dot_dimension_numbers<[1], [0], [0], [1], [0, 0, 1, 1], [], []>} : vector<2x64xf32>, vector<64x256xf32>, vector<2x256xf32> -> vector<2x256xf32>
    %146 = arith.addf %144, %145 : vector<2x256xf32>
    %147 = vector.extract_strided_slice %146 {offsets = [0, 0], sizes = [2, 192], strides = [1, 1]} : vector<2x256xf32> to vector<2x192xf32>
    %148 = arith.negf %147 : vector<2x192xf32>
    %149 = math.exp %148 : vector<2x192xf32>
    %cst_25 = arith.constant 1.000000e+00 : f32
    %150 = vector.broadcast %cst_25 : f32 to vector<2x192xf32>
    %151 = arith.addf %150, %149 : vector<2x192xf32>
    %152 = arith.divf %150, %151 : vector<2x192xf32>
    %153 = vector.extract_strided_slice %152 {offsets = [0, 0], sizes = [2, 64], strides = [1, 1]} : vector<2x192xf32> to vector<2x64xf32>
    %154 = vector.extract_strided_slice %152 {offsets = [0, 64], sizes = [2, 64], strides = [1, 1]} : vector<2x192xf32> to vector<2x64xf32>
    %155 = vector.extract_strided_slice %152 {offsets = [0, 128], sizes = [2, 64], strides = [1, 1]} : vector<2x192xf32> to vector<2x64xf32>
    %156 = vector.extract_strided_slice %146 {offsets = [0, 192], sizes = [2, 64], strides = [1, 1]} : vector<2x256xf32> to vector<2x64xf32>
    %157 = math.tanh %156 : vector<2x64xf32>
    %158 = arith.mulf %154, %141 : vector<2x64xf32>
    %159 = arith.mulf %153, %157 : vector<2x64xf32>
    %160 = arith.addf %158, %159 : vector<2x64xf32>
    %161 = math.tanh %160 : vector<2x64xf32>
    %162 = arith.mulf %155, %161 : vector<2x64xf32>
    %c0_26 = arith.constant 0 : index
    %c0_27 = arith.constant 0 : index
    %163 = vector.load %arg5[%c0_26, %c0_27] : memref<2x64xf32, #tpu.memory_space<vmem>>, vector<2x64xf32>
    tpu.vector_store %arg5[%c0_26, %c0_27], %162 {strides = array<i32>} : memref<2x64xf32, #tpu.memory_space<vmem>>, vector<2x64xf32>,
    return
  }
  func.func @transform_0(%arg0: i32) -> (i32, i32) {
    %c0_i32 = arith.constant 0 : i32
    %c0_i32_0 = arith.constant 0 : i32
    %c0_i32_1 = arith.constant 0 : i32
    return %c0_i32, %c0_i32_0 : i32, i32
  }
  func.func @transform_1(%arg0: i32) -> (i32, i32) {
    %c0_i32 = arith.constant 0 : i32
    %c0_i32_0 = arith.constant 0 : i32
    %c0_i32_1 = arith.constant 0 : i32
    return %c0_i32, %c0_i32_0 : i32, i32
  }
  func.func @transform_2(%arg0: i32) -> (i32, i32) {
    %c0_i32 = arith.constant 0 : i32
    %c0_i32_0 = arith.constant 0 : i32
    %c0_i32_1 = arith.constant 0 : i32
    return %c0_i32, %c0_i32_0 : i32, i32
  }
  func.func @transform_3(%arg0: i32) -> (i32, i32) {
    %c0_i32 = arith.constant 0 : i32
    %c0_i32_0 = arith.constant 0 : i32
    %c0_i32_1 = arith.constant 0 : i32
    return %c0_i32, %c0_i32_0 : i32, i32
  }
  func.func @transform_4(%arg0: i32) -> (i32, i32) {
    %c0_i32 = arith.constant 0 : i32
    %c0_i32_0 = arith.constant 0 : i32
    %c0_i32_1 = arith.constant 0 : i32
    return %c0_i32, %c0_i32_0 : i32, i32
  }
}

</mosaic_0001>

<bundles_post_ra>
// kernel: tpu_custom_call.1
= control target key start
LH: loop header
LB: loop body
LE: loop exit
PB: predicated region body
PF: predicated region fallthrough
CT: control target
= control target key end

     0   :  { %9 = vsyncpa [#allocation3], 0  ;;  %s1742_s0 = inlined_call_operand.hbm [shape: f32[16,64], index: 0, kind: input, shape index: {}]   ;;  %s1743_s1 = inlined_call_operand.hbm [shape: f32[64,256], index: 1, kind: input, shape index: {}]   ;;  %s1744_s2 = inlined_call_operand.hbm [shape: f32[64,256], index: 2, kind: input, shape index: {}]   ;;  %s1745_s3 = inlined_call_operand.vmem [shape: f32[1,256], index: 3, kind: input, shape index: {}]   ;;  %s1746_s4 = inlined_call_operand.hbm [shape: f32[2,64], index: 4, kind: output, shape index: {}]  }
   0x1   :  { %10 = vsyncpa [#allocation6], 0 }
   0x2   :  { %11 = vsyncpa [#allocation4], 0  ;;  %s1488_s15 = smov [#allocation5]   ;;  %s1394_s19 = scalar_lea.hbm %s1743_s1, 2048 }
   0x3   :  { %s29_s16 = sshll.u32 %s1488_s15, 4  ;;  %p1395_p0 = scmp.ne.s32.totalorder %s1743_s1, %s1394_s19  ;;  %s30_s16 = int_to_ptr.vmem [resolvable:$true] %s29_s16 }
   0x4   :  { %p1398_p1 = scmp.lt.u32.totalorder %s1394_s19, %s1743_s1 }
   0x6   :  { %p1400_p2 = pnand %p1398_p1, %p1395_p0 }
   0x8   :  { %1403 = shalt.err (!%p1400_p2)
}
   0x9   :  { %s1404_s24 = scalar_lea.vmem %s30_s16, 2048  ;;  %p1409_p4 = scmp.lt.s32.totalorder %s30_s16, %s30_s16 }
   0xa   :  { %p1405_p3 = scmp.ne.s32.totalorder %s30_s16, %s1404_s24  ;;  %p1410_p5 = scmp.lt.s32.totalorder %s1404_s24, %s1404_s24 }
   0xc   :  { %p1411_p6 = por %p1410_p5, %p1409_p4 }
   0xe   :  { %p1412_p7 = pnand %p1411_p6, %p1405_p3 }
  0x10   :  { %1415 = shalt.err (!%p1412_p7)
}
  0x11   :  { %s1489_s25 = smov 256   ;;  %s1490_s26 = smov 16  }
  0x12   :  { %35 = dma.hbm_to_vmem [thread:$0]  %s1743_s1, 2048, %s30_s16, [#allocation6], %s1489_s25, %s1489_s25, %s1490_s26  }
  0x13   :  { %s1491_s29 = smov [#allocation2]   ;;  %s1416_s7 = scalar_lea.hbm %s1742_s0, 256 }
  0x14   :  { %s17_s30 = sshll.u32 %s1491_s29, 4  ;;  %p1417_p8 = scmp.ne.s32.totalorder %s1742_s0, %s1416_s7  ;;  %s18_s30 = int_to_ptr.vmem [resolvable:$true] %s17_s30 }
  0x15   :  { %p1420_p9 = scmp.lt.u32.totalorder %s1416_s7, %s1742_s0 }
  0x17   :  { %p1422_p10 = pnand %p1420_p9, %p1417_p8 }
  0x19   :  { %1425 = shalt.err (!%p1422_p10)
}
  0x1a   :  { %s1426_s12 = scalar_lea.vmem %s18_s30, 256  ;;  %p1431_p12 = scmp.lt.s32.totalorder %s18_s30, %s18_s30 }
  0x1b   :  { %p1427_p11 = scmp.ne.s32.totalorder %s18_s30, %s1426_s12  ;;  %p1432_p13 = scmp.lt.s32.totalorder %s1426_s12, %s1426_s12 }
  0x1d   :  { %p1433_p0 = por %p1432_p13, %p1431_p12 }
  0x1f   :  { %p1434_p1 = pnand %p1433_p0, %p1427_p11 }
  0x21   :  { %1437 = shalt.err (!%p1434_p1)
}
  0x22   :  { %s1492_s1 = smov 128   ;;  %s1493_s13 = smov 8  }
  0x23   :  { %23 = dma.hbm_to_vmem [thread:$0]  %s1742_s0, 256, %s18_s30, [#allocation3], %s1492_s1, %s1492_s1, %s1493_s13  }
  0x24   :  { %s1494_s16 = smov [#allocation7]   ;;  %s1438_s20 = scalar_lea.hbm %s1744_s2, 2048 }
  0x25   :  { %s41_s17 = sshll.u32 %s1494_s16, 4  ;;  %p1439_p2 = scmp.ne.s32.totalorder %s1744_s2, %s1438_s20  ;;  %s42_s17 = int_to_ptr.vmem [resolvable:$true] %s41_s17 }
  0x26   :  { %p1442_p3 = scmp.lt.u32.totalorder %s1438_s20, %s1744_s2 }
  0x28   :  { %p1444_p4 = pnand %p1442_p3, %p1439_p2 }
  0x2a   :  { %1447 = shalt.err (!%p1444_p4)
}
  0x2b   :  { %s1448_s27 = scalar_lea.vmem %s42_s17, 2048  ;;  %p1453_p6 = scmp.lt.s32.totalorder %s42_s17, %s42_s17 }
  0x2c   :  { %p1449_p5 = scmp.ne.s32.totalorder %s42_s17, %s1448_s27  ;;  %p1454_p7 = scmp.lt.s32.totalorder %s1448_s27, %s1448_s27 }
  0x2e   :  { %p1455_p8 = por %p1454_p7, %p1453_p6 }
  0x30   :  { %p1456_p9 = pnand %p1455_p8, %p1449_p5 }
  0x32   :  { %1459 = shalt.err (!%p1456_p9)
}
  0x33   :  { %47 = dma.hbm_to_vmem [thread:$0]  %s1744_s2, 2048, %s42_s17, [#allocation6], %s1489_s25, %s1489_s25, %s1490_s26  }
  0x34   :  { %1482 = dma.done.wait [#allocation3], 256  }
  0x35   :  { %1483 = vsyncadd [#allocation3], 4294967040 }
  0x36   :  { %1484 = dma.done.wait [#allocation6], 4096  }
  0x37   :  { %1485 = vsyncadd [#allocation6], 4294963200  ;;  %v1495_v0 = vmov 0.0   ;;  %v60_v1 = vld [vmem:[#allocation5 + $0x8] sm:$0xff]  ;;  %v62_v2 = vld [vmem:[#allocation5 + $0x18] sm:$0xff]  ;;  %vm107_vm0 = vcmask 523264   ;;  %v97_v51 = vlaneseq }
  0x38   :  { %178 = vmatprep.mubr.f32.mxu0 %v1495_v0  ;;  %258 = vmatprep.mubr.f32.mxu1 %v1495_v0  ;;  %v59_v3 = vld [vmem:[#allocation5] sm:$0xff]  ;;  %v1144_v4 = vpack.c.bf16 %v62_v2, %v60_v1  ;;  %v61_v5 = vld [vmem:[#allocation5 + $0x10] sm:$0xff]  ;;  %v76_v6 = vld [vmem:[#allocation7 + $0x8] sm:$0xff]  ;;  %s1496_s26 = smov 64   ;;  %vm1101_vm1 = vcmask 523270  }
  0x39   :  { %v78_v7 = vld [vmem:[#allocation7 + $0x18] sm:$0xff]  ;;  %v1146_v8 = vpack.c.bf16 %v61_v5, %v59_v3  ;;  %v75_v10 = vld [vmem:[#allocation7] sm:$0xff]  ;;  %v77_v11 = vld [vmem:[#allocation7 + $0x10] sm:$0xff]  ;;  %v98_v52 = vshrl.u32 %v97_v51, 7 }
  0x3a   :  { %v1567_v9 = vpack.c.bf16 %v78_v7, %v76_v6  ;;  %v64_v12 = vld [vmem:[#allocation5 + $0x28] sm:$0xff]  ;;  %1145 = vmatprep.subr.bf16.mxu0 %v1144_v4  ;;  %v1569_v13 = vpack.c.bf16 %v77_v11, %v75_v10  ;;  %v66_v14 = vld [vmem:[#allocation5 + $0x38] sm:$0xff]  ;;  %v63_v15 = vld [vmem:[#allocation5 + $0x20] sm:$0xff] }
  0x3b   :  { %v65_v16 = vld [vmem:[#allocation5 + $0x30] sm:$0xff]  ;;  %1147 = vmatpush1.bf16.msra.mxu0 %v1146_v8  ;;  %v1148_v17 = vpack.c.bf16 %v66_v14, %v64_v12  ;;  %v80_v19 = vld [vmem:[#allocation7 + $0x28] sm:$0xff]  ;;  %v82_v20 = vld [vmem:[#allocation7 + $0x38] sm:$0xff]  ;;  %v103_v53 = vsub.s32 1, %v98_v52  ;;  %v99_v63 = vsub.s32 0, %v98_v52 }
  0x3c   :  { %1161 = vmatprep.subr.bf16.mxu1 %v1567_v9  ;;  %v1150_v18 = vpack.c.bf16 %v65_v16, %v63_v15  ;;  %v79_v21 = vld [vmem:[#allocation7 + $0x20] sm:$0xff]  ;;  %v1573_v22 = vpack.c.bf16 %v82_v20, %v80_v19  ;;  %v81_v23 = vld [vmem:[#allocation7 + $0x30] sm:$0xff]  ;;  %v68_v24 = vld [vmem:[#allocation5 + $0x48] sm:$0xff] }
  0x3d   :  { %1163 = vmatpush1.bf16.msra.mxu1 %v1569_v13  ;;  %v70_v25 = vld [vmem:[#allocation5 + $0x58] sm:$0xff]  ;;  %1149 = vmatprep.subr.bf16.mxu0 %v1148_v17  ;;  %v1575_v26 = vpack.c.bf16 %v81_v23, %v79_v21  ;;  %v67_v28 = vld [vmem:[#allocation5 + $0x40] sm:$0xff]  ;;  %v69_v29 = vld [vmem:[#allocation5 + $0x50] sm:$0xff] }
  0x3e   :  { %v1152_v27 = vpack.c.bf16 %v70_v25, %v68_v24  ;;  %v84_v30 = vld [vmem:[#allocation7 + $0x48] sm:$0xff]  ;;  %1165 = vmatprep.subr.bf16.mxu1 %v1573_v22  ;;  %v86_v31 = vld [vmem:[#allocation7 + $0x58] sm:$0xff]  ;;  %v83_v32 = vld [vmem:[#allocation7 + $0x40] sm:$0xff]  ;;  %v1154_v34 = vpack.c.bf16 %v69_v29, %v67_v28 }
  0x3f   :  { %v85_v33 = vld [vmem:[#allocation7 + $0x50] sm:$0xff]  ;;  %1151 = vmatpush1.bf16.msra.mxu0 %v1150_v18  ;;  %v1578_v35 = vpack.c.bf16 %v86_v31, %v84_v30  ;;  %v72_v36 = vld [vmem:[#allocation5 + $0x68] sm:$0xff]  ;;  %v74_v37 = vld [vmem:[#allocation5 + $0x78] sm:$0xff] }
  0x40   :  { %v71_v38 = vld [vmem:[#allocation5 + $0x60] sm:$0xff]  ;;  %1153 = vmatprep.subr.bf16.mxu0 %v1152_v27  ;;  %v1581_v39 = vpack.c.bf16 %v85_v33, %v83_v32  ;;  %v1156_v40 = vpack.c.bf16 %v74_v37, %v72_v36  ;;  %v73_v41 = vld [vmem:[#allocation5 + $0x70] sm:$0xff]  ;;  %v88_v42 = vld [vmem:[#allocation7 + $0x68] sm:$0xff] }
  0x41   :  { %1167 = vmatpush1.bf16.msra.mxu1 %v1575_v26  ;;  %v90_v43 = vld [vmem:[#allocation7 + $0x78] sm:$0xff]  ;;  %v87_v45 = vld [vmem:[#allocation7 + $0x60] sm:$0xff]  ;;  %v89_v46 = vld [vmem:[#allocation7 + $0x70] sm:$0xff]  ;;  %v1158_v47 = vpack.c.bf16 %v73_v41, %v71_v38 }
  0x42   :  { %1169 = vmatprep.subr.bf16.mxu1 %v1578_v35  ;;  %v1584_v44 = vpack.c.bf16 %v90_v43, %v88_v42  ;;  %v92_v48 = vld [vmem:[#allocation2] sm:$0xff]  ;;  %v1587_v49 = vpack.c.bf16 %v89_v46, %v87_v45  ;;  %v93_v11 = vld [vmem:[#allocation2 + $0x8] sm:$0xff] }
  0x43   :  { %1155 = vmatpush1.bf16.msra.mxu0 %v1154_v34  ;;  %v94_v50 = vmax.f32 %v92_v48, 1e-07  ;;  %v91_v54 = vld [vmem:[%s1745_s3] sm:$0x3]  ;;  %v95_v12 = vmax.f32 %v93_v11, 1e-07 }
  0x44   :  { %1157 = vmatprep.subr.bf16.mxu0 %v1156_v40  ;;  %v1616_v55 = vrot.slane %v91_v54, %v103_v53  ;;  %v1623_v1 = vrot.slane %v91_v54, %v99_v63  ;;  %s1497_s3 = smov [#allocation8]  }
  0x45   :  { %1171 = vmatpush1.bf16.msra.mxu1 %v1581_v39  ;;  %s1109_s29 = sshll.u32 %s1497_s3, 4  ;;  %s1110_s29 = int_to_ptr.vmem [resolvable:$true] %s1109_s29 }
  0x46   :  { %1173 = vmatprep.subr.bf16.mxu1 %v1584_v44  ;;  %s1460_s30 = scalar_lea.vmem %s1110_s29, 32  ;;  %p1465_p11 = scmp.lt.s32.totalorder %s1110_s29, %s1110_s29 }
  0x47   :  { %1159 = vmatpush1.bf16.msra.mxu0 %v1158_v47  ;;  %p1461_p10 = scmp.ne.s32.totalorder %s1110_s29, %s1460_s30  ;;  %p1466_p12 = scmp.lt.s32.totalorder %s1460_s30, %s1460_s30 }
  0x48   :  { %1177 = vmatprep.subr.bf16.mxu0 %v1567_v9 }
  0x49   :  { %1175 = vmatpush1.bf16.msra.mxu1 %v1587_v49  ;;  %p1467_p13 = por %p1466_p12, %p1465_p11 }
  0x4a   :  { %1193 = vmatprep.subr.bf16.mxu1 %v1567_v9  ;;  %1119 = vmatmul.mubr.msk.f32.vlgmr.msra.gmra.mrb[0].mxu0 %vm107_vm0, %v94_v50 }
  0x4b   :  { %1179 = vmatpush1.bf16.msra.mxu0 %v1569_v13  ;;  %184 = vmatprep.mubr.f32.mxu0 %v1495_v0  ;;  %p1468_p0 = pnand %p1467_p13, %p1461_p10 }
  0x4c   :  { %259 = vmatmul.mubr.f32.vlgmr.msra.gmra.mrb[0].mxu1 %v1495_v0  ;;  %1181 = vmatprep.subr.bf16.mxu0 %v1573_v22 }
  0x4d   :  { %1195 = vmatpush1.bf16.msra.mxu1 %v1569_v13  ;;  %480 = vmatprep.mubr.f32.mxu1 %v1495_v0 }
  0x4e   :  { %1197 = vmatprep.subr.bf16.mxu1 %v1573_v22  ;;  %1120 = vmatmul.mubr.msk.f32.gmra.mrb[2].mxu0 %vm107_vm0, %v95_v12 }
  0x4f   :  { %1183 = vmatpush1.bf16.msra.mxu0 %v1575_v26  ;;  %364 = vmatprep.mubr.f32.mxu0 %v1495_v0 }
  0x50   :  { %1185 = vmatprep.subr.bf16.mxu0 %v1578_v35 }
  0x51   :  { %1199 = vmatpush1.bf16.msra.mxu1 %v1575_v26 }
  0x52   :  { %1201 = vmatprep.subr.bf16.mxu1 %v1578_v35 }
  0x53   :  { %1187 = vmatpush1.bf16.msra.mxu0 %v1581_v39 }
  0x54   :  { %1189 = vmatprep.subr.bf16.mxu0 %v1584_v44 }
  0x55   :  { %1203 = vmatpush1.bf16.msra.mxu1 %v1581_v39 }
  0x56   :  { %1205 = vmatprep.subr.bf16.mxu1 %v1584_v44 }
  0x57   :  { %1191 = vmatpush1.bf16.msra.mxu0 %v1587_v49 }
  0x58   :  { %1209 = vmatprep.subr.bf16.mxu0 %v1567_v9 }
  0x59   :  { %1207 = vmatpush1.bf16.msra.mxu1 %v1587_v49 }
  0x5a   :  { %1225 = vmatprep.subr.bf16.mxu1 %v1567_v9 }
 0x11d   :  { %v180_v56 = vpop.f32.mrb[0].mxu0 }
 0x11e   :  { %v182_v57 = vpop.f32.mrb[1].mxu0  ;;  %v1626_v2 = vadd.f32 %v180_v56, %v1623_v1 }
 0x11f   :  { %v260_v58 = vpop.f32.mrb[0].mxu1  ;;  %v1619_v59 = vadd.f32 %v182_v57, %v1616_v55 }
 0x120   :  { %v262_v60 = vpop.f32.mrb[1].mxu1  ;;  %v265_v3 = vadd.f32 %v260_v58, %v1626_v2 }
 0x121   :  { %v266_v61 = vadd.f32 %v262_v60, %v1619_v59  ;;  %v1633_v19 = vpop.f32.mrb[2].mxu0 }
 0x122   :  { %v1121_v4 = vmul.f32 -1.442695, %v265_v3  ;;  %v1635_v20 = vpop.f32.mrb[3].mxu0 }
 0x123   :  { %1298 = vtanh.f32 %v266_v61  ;;  %v1122_v18 = vmul.f32 -1.442695, %v266_v61 }
 0x124   :  { %1300 = vpow2.f32 %v1121_v4 }
 0x12d   :  { %v1299_v62 = vpop.eup %1298 }
 0x12e   :  { %282 = vrot.lane.b32.xlu0 %v1299_v62, %s1496_s26  ;;  %v1301_v5 = vpop.eup %1300 }
 0x12f   :  { %v273_v6 = vadd.f32 1.0, %v1301_v5 }
 0x131   :  { %1302 = vrcp.f32 %v273_v6 }
 0x13b   :  { %v1303_v7 = vpop.eup %1302 }
 0x13c   :  { %v280_v14 = vmul.f32 0.0, %v1303_v7 }
 0x1a0   :  { %v283_v8 = vpop.permute.xlu0 %282 }
 0x1a1   :  { %v285_v10 = vmul.f32 %v1303_v7, %v283_v8 }
 0x1a3   :  { %287 = vrot.lane.b32.xlu0 %v285_v10, %s1496_s26 }
 0x215   :  { %v288_v15 = vpop.permute.xlu0 %287 }
 0x216   :  { %v290_v16 = vadd.f32 %v288_v15, %v280_v14 }
 0x218   :  { %1304 = vtanh.f32 %v290_v16  ;;  %v393_v43 = vrot.slane %v290_v16, 6 }
 0x219   :  { %1306 = vpow2.f32 %v1122_v18 }
 0x222   :  { %v1305_v17 = vpop.eup %1304 }
 0x223   :  { %293 = vrot.lane.b32.xlu1 %v1305_v17, %s1496_s26  ;;  %v1307_v21 = vpop.eup %1306 }
 0x224   :  { %v274_v23 = vadd.f32 1.0, %v1307_v21 }
 0x226   :  { %1308 = vrcp.f32 %v274_v23 }
 0x230   :  { %v1309_v24 = vpop.eup %1308 }
 0x295   :  { %v294_v25 = vpop.permute.xlu1 %293 }
 0x296   :  { %v296_v27 = vmul.f32 %v1309_v24, %v294_v25 }
 0x298   :  { %1123 = vmatmul.mubr.msk.f32.vlgmr.msra.gmra.mrb[4].mxu0 %vm107_vm0, %v296_v27 }
 0x299   :  { %1211 = vmatpush1.bf16.msra.mxu0 %v1569_v13  ;;  %596 = vmatprep.mubr.f32.mxu0 %v1495_v0 }
 0x29a   :  { %1213 = vmatprep.subr.bf16.mxu0 %v1573_v22 }
 0x29d   :  { %1215 = vmatpush1.bf16.msra.mxu0 %v1575_v26 }
 0x29e   :  { %1217 = vmatprep.subr.bf16.mxu0 %v1578_v35 }
 0x2a1   :  { %1219 = vmatpush1.bf16.msra.mxu0 %v1581_v39 }
 0x2a2   :  { %1221 = vmatprep.subr.bf16.mxu0 %v1584_v44 }
 0x2a5   :  { %1223 = vmatpush1.bf16.msra.mxu0 %v1587_v49 }
 0x2a6   :  { %1241 = vmatprep.subr.bf16.mxu0 %v1567_v9 }
 0x36b   :  { %v366_v28 = vpop.f32.mrb[4].mxu0 }
 0x36c   :  { %v368_v29 = vpop.f32.mrb[5].mxu0  ;;  %v373_v33 = vrot.slane %v366_v28, 6 }
 0x36d   :  { %v374_v30 = vrot.slane %v368_v29, 6 }
 0x36e   :  { %v377_v34 = vadd.f32 %v373_v33, %v1626_v2 }
 0x36f   :  { %v378_v31 = vadd.f32 %v374_v30, %v1619_v59 }
 0x370   :  { %v1124_v36 = vmul.f32 -1.442695, %v377_v34 }
 0x371   :  { %1310 = vtanh.f32 %v378_v31  ;;  %v1125_v50 = vmul.f32 -1.442695, %v378_v31 }
 0x372   :  { %1312 = vpow2.f32 %v1124_v36 }
 0x37b   :  { %v1311_v32 = vpop.eup %1310 }
 0x37c   :  { %397 = vrot.lane.b32.xlu1 %v1311_v32, %s1496_s26  ;;  %v1313_v37 = vpop.eup %1312 }
 0x37d   :  { %v385_v38 = vadd.f32 1.0, %v1313_v37 }
 0x37f   :  { %1314 = vrcp.f32 %v385_v38 }
 0x389   :  { %v1315_v40 = vpop.eup %1314 }
 0x38a   :  { %v395_v45 = vmul.f32 %v1315_v40, %v393_v43 }
 0x3ee   :  { %v398_v41 = vpop.permute.xlu1 %397 }
 0x3ef   :  { %v400_v42 = vmul.f32 %v1315_v40, %v398_v41 }
 0x3f1   :  { %402 = vrot.lane.b32.xlu0 %v400_v42, %s1496_s26 }
 0x463   :  { %v403_v46 = vpop.permute.xlu0 %402 }
 0x464   :  { %v405_v47 = vadd.f32 %v403_v46, %v395_v45 }
 0x466   :  { %1316 = vtanh.f32 %v405_v47  ;;  %v509_v12 = vrot.slane %v405_v47, 6 }
 0x467   :  { %1318 = vpow2.f32 %v1125_v50 }
 0x470   :  { %v1317_v48 = vpop.eup %1316 }
 0x471   :  { %408 = vrot.lane.b32.xlu1 %v1317_v48, %s1496_s26  ;;  %v1319_v51 = vpop.eup %1318 }
 0x472   :  { %v386_v52 = vadd.f32 1.0, %v1319_v51 }
 0x474   :  { %1320 = vrcp.f32 %v386_v52 }
 0x47e   :  { %v1321_v53 = vpop.eup %1320 }
 0x4e3   :  { %v409_v54 = vpop.permute.xlu1 %408 }
 0x4e4   :  { %v411_v56 = vmul.f32 %v1321_v53, %v409_v54 }
 0x4e6   :  { %v413_v57 = vrot.slane %v411_v56, 2  ;;  %v1693_v56 = vadd.f32 %v1635_v20, %v1616_v55 }
 0x4e8   :  { %1126 = vmatmul.mubr.msk.f32.vlgmr.msra.gmra.mrb[2].mxu1 %vm107_vm0, %v413_v57 }
 0x4e9   :  { %1227 = vmatpush1.bf16.msra.mxu1 %v1569_v13  ;;  %712 = vmatprep.mubr.f32.mxu1 %v1495_v0 }
 0x4ea   :  { %1229 = vmatprep.subr.bf16.mxu1 %v1573_v22 }
 0x4ed   :  { %1231 = vmatpush1.bf16.msra.mxu1 %v1575_v26 }
 0x4ee   :  { %1233 = vmatprep.subr.bf16.mxu1 %v1578_v35 }
 0x4f1   :  { %1235 = vmatpush1.bf16.msra.mxu1 %v1581_v39 }
 0x4f2   :  { %1237 = vmatprep.subr.bf16.mxu1 %v1584_v44 }
 0x4f5   :  { %1239 = vmatpush1.bf16.msra.mxu1 %v1587_v49 }
 0x4f6   :  { %1257 = vmatprep.subr.bf16.mxu1 %v1567_v9 }
 0x5bb   :  { %v482_v58 = vpop.f32.mrb[2].mxu1 }
 0x5bc   :  { %v484_v60 = vpop.f32.mrb[3].mxu1  ;;  %v489_v3 = vrot.slane %v482_v58, 4 }
 0x5bd   :  { %v490_v61 = vrot.slane %v484_v60, 4 }
 0x5be   :  { %v493_v4 = vadd.f32 %v489_v3, %v1626_v2 }
 0x5bf   :  { %v494_v62 = vadd.f32 %v490_v61, %v1619_v59 }
 0x5c0   :  { %v1127_v5 = vmul.f32 -1.442695, %v493_v4 }
 0x5c1   :  { %1322 = vtanh.f32 %v494_v62  ;;  %v1128_v18 = vmul.f32 -1.442695, %v494_v62  ;;  %v1699_v62 = vadd.f32 %v1633_v19, %v1623_v1 }
 0x5c2   :  { %1324 = vpow2.f32 %v1127_v5 }
 0x5cb   :  { %v1323_v63 = vpop.eup %1322 }
 0x5cc   :  { %513 = vrot.lane.b32.xlu0 %v1323_v63, %s1496_s26  ;;  %v1325_v6 = vpop.eup %1324 }
 0x5cd   :  { %v501_v7 = vadd.f32 1.0, %v1325_v6 }
 0x5cf   :  { %1326 = vrcp.f32 %v501_v7 }
 0x5d9   :  { %v1327_v8 = vpop.eup %1326 }
 0x5da   :  { %v511_v14 = vmul.f32 %v1327_v8, %v509_v12 }
 0x63e   :  { %v514_v10 = vpop.permute.xlu0 %513 }
 0x63f   :  { %v516_v11 = vmul.f32 %v1327_v8, %v514_v10 }
 0x641   :  { %518 = vrot.lane.b32.xlu1 %v516_v11, %s1496_s26 }
 0x6b3   :  { %v519_v15 = vpop.permute.xlu1 %518 }
 0x6b4   :  { %v521_v16 = vadd.f32 %v519_v15, %v511_v14 }
 0x6b6   :  { %1328 = vtanh.f32 %v521_v16  ;;  %v625_v43 = vrot.slane %v521_v16, 6 }
 0x6b7   :  { %1330 = vpow2.f32 %v1128_v18 }
 0x6c0   :  { %v1329_v17 = vpop.eup %1328 }
 0x6c1   :  { %524 = vrot.lane.b32.xlu0 %v1329_v17, %s1496_s26  ;;  %v1331_v21 = vpop.eup %1330 }
 0x6c2   :  { %v502_v23 = vadd.f32 1.0, %v1331_v21 }
 0x6c4   :  { %1332 = vrcp.f32 %v502_v23 }
 0x6ce   :  { %v1333_v24 = vpop.eup %1332 }
 0x733   :  { %v525_v25 = vpop.permute.xlu0 %524 }
 0x734   :  { %v527_v27 = vmul.f32 %v1333_v24, %v525_v25 }
 0x736   :  { %v529_v28 = vrot.slane %v527_v27, 4 }
 0x738   :  { %1129 = vmatmul.mubr.msk.f32.vlgmr.msra.gmra.mrb[6].mxu0 %vm107_vm0, %v529_v28 }
 0x739   :  { %1243 = vmatpush1.bf16.msra.mxu0 %v1569_v13  ;;  %821 = vmatprep.mubr.f32.mxu0 %v1495_v0 }
 0x73a   :  { %1245 = vmatprep.subr.bf16.mxu0 %v1573_v22 }
 0x73d   :  { %1247 = vmatpush1.bf16.msra.mxu0 %v1575_v26 }
 0x73e   :  { %1249 = vmatprep.subr.bf16.mxu0 %v1578_v35 }
 0x741   :  { %1251 = vmatpush1.bf16.msra.mxu0 %v1581_v39 }
 0x742   :  { %1253 = vmatprep.subr.bf16.mxu0 %v1584_v44 }
 0x745   :  { %1255 = vmatpush1.bf16.msra.mxu0 %v1587_v49 }
 0x746   :  { %1273 = vmatprep.subr.bf16.mxu0 %v1567_v9 }
 0x80b   :  { %v598_v29 = vpop.f32.mrb[6].mxu0 }
 0x80c   :  { %v600_v30 = vpop.f32.mrb[7].mxu0  ;;  %v605_v34 = vrot.slane %v598_v29, 2 }
 0x80d   :  { %v606_v31 = vrot.slane %v600_v30, 2 }
 0x80e   :  { %v609_v36 = vadd.f32 %v605_v34, %v1626_v2 }
 0x80f   :  { %v610_v32 = vadd.f32 %v606_v31, %v1619_v59 }
 0x810   :  { %v1130_v37 = vmul.f32 -1.442695, %v609_v36 }
 0x811   :  { %1334 = vtanh.f32 %v610_v32  ;;  %v1131_v48 = vmul.f32 -1.442695, %v610_v32 }
 0x812   :  { %1336 = vpow2.f32 %v1130_v37 }
 0x81b   :  { %v1335_v33 = vpop.eup %1334 }
 0x81c   :  { %629 = vrot.lane.b32.xlu1 %v1335_v33, %s1496_s26  ;;  %v1337_v38 = vpop.eup %1336 }
 0x81d   :  { %v617_v40 = vadd.f32 1.0, %v1337_v38 }
 0x81f   :  { %1338 = vrcp.f32 %v617_v40 }
 0x829   :  { %v1339_v41 = vpop.eup %1338 }
 0x82a   :  { %v627_v45 = vmul.f32 %v1339_v41, %v625_v43 }
 0x88e   :  { %v630_v42 = vpop.permute.xlu1 %629 }
 0x88f   :  { %v632_v9 = vmul.f32 %v1339_v41, %v630_v42 }
 0x891   :  { %634 = vrot.lane.b32.xlu0 %v632_v9, %s1496_s26 }
 0x903   :  { %v635_v59 = vpop.permute.xlu0 %634 }
 0x904   :  { %v637_v46 = vadd.f32 %v635_v59, %v627_v45 }
 0x906   :  { %1340 = vtanh.f32 %v637_v46  ;;  %v735_v7 = vrot.slane %v637_v46, 6 }
 0x907   :  { %1342 = vpow2.f32 %v1131_v48 }
 0x910   :  { %v1341_v47 = vpop.eup %1340 }
 0x911   :  { %640 = vrot.lane.b32.xlu1 %v1341_v47, %s1496_s26  ;;  %v1343_v2 = vpop.eup %1342 }
 0x912   :  { %v618_v50 = vadd.f32 1.0, %v1343_v2 }
 0x914   :  { %1344 = vrcp.f32 %v618_v50 }
 0x91e   :  { %v1345_v51 = vpop.eup %1344 }
 0x983   :  { %v641_v52 = vpop.permute.xlu1 %640 }
 0x984   :  { %v643_v53 = vmul.f32 %v1345_v51, %v641_v52 }
 0x986   :  { %v645_v54 = vrot.slane %v643_v53, 6 }
 0x988   :  { %1132 = vmatmul.mubr.msk.f32.vlgmr.msra.gmra.mrb[4].mxu1 %vm107_vm0, %v645_v54 }
 0x989   :  { %1259 = vmatpush1.bf16.msra.mxu1 %v1569_v13  ;;  %937 = vmatprep.mubr.f32.mxu1 %v1495_v0 }
 0x98a   :  { %1261 = vmatprep.subr.bf16.mxu1 %v1573_v22 }
 0x98d   :  { %1263 = vmatpush1.bf16.msra.mxu1 %v1575_v26 }
 0x98e   :  { %1265 = vmatprep.subr.bf16.mxu1 %v1578_v35 }
 0x991   :  { %1267 = vmatpush1.bf16.msra.mxu1 %v1581_v39 }
 0x992   :  { %1269 = vmatprep.subr.bf16.mxu1 %v1584_v44 }
 0x995   :  { %1271 = vmatpush1.bf16.msra.mxu1 %v1587_v49 }
 0xa5b   :  { %v714_v57 = vpop.f32.mrb[4].mxu1 }
 0xa5c   :  { %v716_v58 = vpop.f32.mrb[5].mxu1  ;;  %v719_v63 = vadd.f32 %v714_v57, %v1699_v62 }
 0xa5d   :  { %v720_v60 = vadd.f32 %v716_v58, %v1693_v56 }
 0xa5e   :  { %v1133_v3 = vmul.f32 -1.442695, %v719_v63 }
 0xa5f   :  { %1346 = vtanh.f32 %v720_v60  ;;  %v1134_v1 = vmul.f32 -1.442695, %v720_v60 }
 0xa60   :  { %1348 = vpow2.f32 %v1133_v3 }
 0xa69   :  { %v1347_v61 = vpop.eup %1346 }
 0xa6a   :  { %739 = vrot.lane.b32.xlu0 %v1347_v61, %s1496_s26  ;;  %v1349_v4 = vpop.eup %1348 }
 0xa6b   :  { %v727_v5 = vadd.f32 1.0, %v1349_v4 }
 0xa6d   :  { %1350 = vrcp.f32 %v727_v5 }
 0xa77   :  { %v1351_v55 = vpop.eup %1350 }
 0xa78   :  { %v737_v8 = vmul.f32 %v1351_v55, %v735_v7 }
 0xadc   :  { %v740_v20 = vpop.permute.xlu0 %739 }
 0xadd   :  { %v742_v6 = vmul.f32 %v1351_v55, %v740_v20 }
 0xadf   :  { %744 = vrot.lane.b32.xlu1 %v742_v6, %s1496_s26 }
 0xb51   :  { %v745_v10 = vpop.permute.xlu1 %744 }
 0xb52   :  { %v747_v11 = vadd.f32 %v745_v10, %v737_v8 }
 0xb54   :  { %1352 = vtanh.f32 %v747_v11  ;;  %v850_v27 = vrot.slane %v747_v11, 6 }
 0xb55   :  { %1354 = vpow2.f32 %v1134_v1 }
 0xb5e   :  { %v1353_v12 = vpop.eup %1352 }
 0xb5f   :  { %750 = vrot.lane.b32.xlu0 %v1353_v12, %s1496_s26  ;;  %v1355_v19 = vpop.eup %1354 }
 0xb60   :  { %v728_v14 = vadd.f32 1.0, %v1355_v19 }
 0xb62   :  { %1356 = vrcp.f32 %v728_v14 }
 0xb6c   :  { %v1357_v15 = vpop.eup %1356 }
 0xbd1   :  { %v751_v16 = vpop.permute.xlu0 %750 }
 0xbd2   :  { %v753_v17 = vmul.f32 %v1357_v15, %v751_v16 }
 0xbd4   :  { %1135 = vmatmul.mubr.msk.f32.vlgmr.msra.gmra.mrb[8].mxu0 %vm107_vm0, %v753_v17 }
 0xbd5   :  { %1275 = vmatpush1.bf16.msra.mxu0 %v1569_v13  ;;  %1053 = vmatprep.mubr.f32.mxu0 %v1495_v0 }
 0xbd6   :  { %1277 = vmatprep.subr.bf16.mxu0 %v1573_v22 }
 0xbd9   :  { %1279 = vmatpush1.bf16.msra.mxu0 %v1575_v26 }
 0xbda   :  { %1281 = vmatprep.subr.bf16.mxu0 %v1578_v35 }
 0xbdd   :  { %1283 = vmatpush1.bf16.msra.mxu0 %v1581_v39 }
 0xbde   :  { %1285 = vmatprep.subr.bf16.mxu0 %v1584_v44 }
 0xbe1   :  { %1287 = vmatpush1.bf16.msra.mxu0 %v1587_v49 }
 0xca7   :  { %v823_v18 = vpop.f32.mrb[8].mxu0 }
 0xca8   :  { %v825_v21 = vpop.f32.mrb[9].mxu0  ;;  %v830_v0 = vrot.slane %v823_v18, 6 }
 0xca9   :  { %v831_v23 = vrot.slane %v825_v21, 6 }
 0xcaa   :  { %v834_v22 = vadd.f32 %v830_v0, %v1699_v62 }
 0xcab   :  { %v835_v24 = vadd.f32 %v831_v23, %v1693_v56 }
 0xcac   :  { %v1136_v26 = vmul.f32 -1.442695, %v834_v22 }
 0xcad   :  { %1358 = vtanh.f32 %v835_v24  ;;  %v1137_v32 = vmul.f32 -1.442695, %v835_v24 }
 0xcae   :  { %1360 = vpow2.f32 %v1136_v26 }
 0xcb7   :  { %v1359_v13 = vpop.eup %1358 }
 0xcb8   :  { %854 = vrot.lane.b32.xlu1 %v1359_v13, %s1496_s26  ;;  %v1361_v35 = vpop.eup %1360 }
 0xcb9   :  { %v842_v39 = vadd.f32 1.0, %v1361_v35 }
 0xcbb   :  { %1362 = vrcp.f32 %v842_v39 }
 0xcc5   :  { %v1363_v44 = vpop.eup %1362 }
 0xcc6   :  { %v852_v28 = vmul.f32 %v1363_v44, %v850_v27 }
 0xd2a   :  { %v855_v25 = vpop.permute.xlu1 %854 }
 0xd2b   :  { %v857_v49 = vmul.f32 %v1363_v44, %v855_v25 }
 0xd2d   :  { %859 = vrot.lane.b32.xlu0 %v857_v49, %s1496_s26 }
 0xd9f   :  { %v860_v29 = vpop.permute.xlu0 %859 }
 0xda0   :  { %v862_v30 = vadd.f32 %v860_v29, %v852_v28 }
 0xda2   :  { %1364 = vtanh.f32 %v862_v30  ;;  %v966_v53 = vrot.slane %v862_v30, 6 }
 0xda3   :  { %1366 = vpow2.f32 %v1137_v32 }
 0xdac   :  { %v1365_v31 = vpop.eup %1364 }
 0xdad   :  { %865 = vrot.lane.b32.xlu1 %v1365_v31, %s1496_s26  ;;  %v1367_v33 = vpop.eup %1366 }
 0xdae   :  { %v843_v34 = vadd.f32 1.0, %v1367_v33 }
 0xdb0   :  { %1368 = vrcp.f32 %v843_v34 }
 0xdba   :  { %v1369_v36 = vpop.eup %1368 }
 0xe1f   :  { %v866_v37 = vpop.permute.xlu1 %865 }
 0xe20   :  { %v868_v38 = vmul.f32 %v1369_v36, %v866_v37 }
 0xe22   :  { %v870_v40 = vrot.slane %v868_v38, 2 }
 0xe24   :  { %1138 = vmatmul.mubr.msk.f32.vlgmr.msra.gmra.mrb[6].mxu1 %vm107_vm0, %v870_v40 }
 0xef7   :  { %v939_v41 = vpop.f32.mrb[6].mxu1 }
 0xef8   :  { %v941_v42 = vpop.f32.mrb[7].mxu1  ;;  %v946_v59 = vrot.slane %v939_v41, 4 }
 0xef9   :  { %v947_v9 = vrot.slane %v941_v42, 4 }
 0xefa   :  { %v950_v46 = vadd.f32 %v946_v59, %v1699_v62 }
 0xefb   :  { %v951_v43 = vadd.f32 %v947_v9, %v1693_v56 }
 0xefc   :  { %v1139_v47 = vmul.f32 -1.442695, %v950_v46 }
 0xefd   :  { %1370 = vtanh.f32 %v951_v43  ;;  %v1140_v61 = vmul.f32 -1.442695, %v951_v43 }
 0xefe   :  { %1372 = vpow2.f32 %v1139_v47 }
 0xf07   :  { %v1371_v45 = vpop.eup %1370 }
 0xf08   :  { %970 = vrot.lane.b32.xlu0 %v1371_v45, %s1496_s26  ;;  %v1373_v48 = vpop.eup %1372 }
 0xf09   :  { %v958_v2 = vadd.f32 1.0, %v1373_v48 }
 0xf0b   :  { %1374 = vrcp.f32 %v958_v2 }
 0xf15   :  { %v1375_v50 = vpop.eup %1374 }
 0xf16   :  { %v968_v54 = vmul.f32 %v1375_v50, %v966_v53 }
 0xf7a   :  { %v971_v51 = vpop.permute.xlu0 %970 }
 0xf7b   :  { %v973_v52 = vmul.f32 %v1375_v50, %v971_v51 }
 0xf7d   :  { %975 = vrot.lane.b32.xlu1 %v973_v52, %s1496_s26 }
 0xfef   :  { %v976_v57 = vpop.permute.xlu1 %975 }
 0xff0   :  { %v978_v58 = vadd.f32 %v976_v57, %v968_v54 }
 0xff2   :  { %1376 = vtanh.f32 %v978_v58  ;;  %v1082_v21 = vrot.slane %v978_v58, 6 }
 0xff3   :  { %1378 = vpow2.f32 %v1140_v61 }
 0xffc   :  { %v1377_v60 = vpop.eup %1376 }
 0xffd   :  { %981 = vrot.lane.b32.xlu0 %v1377_v60, %s1496_s26  ;;  %v1379_v63 = vpop.eup %1378 }
 0xffe   :  { %v959_v3 = vadd.f32 1.0, %v1379_v63 }
0x1000   :  { %1380 = vrcp.f32 %v959_v3 }
0x100a   :  { %v1381_v4 = vpop.eup %1380 }
0x106f   :  { %v982_v5 = vpop.permute.xlu0 %981 }
0x1070   :  { %v984_v55 = vmul.f32 %v1381_v4, %v982_v5 }
0x1072   :  { %v986_v20 = vrot.slane %v984_v55, 4 }
0x1074   :  { %1141 = vmatmul.mubr.msk.f32.vlgmr.msra.gmra.mrb[10].mxu0 %vm107_vm0, %v986_v20 }
0x1147   :  { %v1055_v6 = vpop.f32.mrb[10].mxu0 }
0x1148   :  { %v1057_v7 = vpop.f32.mrb[11].mxu0  ;;  %v1062_v12 = vrot.slane %v1055_v6, 2 }
0x1149   :  { %v1063_v8 = vrot.slane %v1057_v7, 2 }
0x114a   :  { %v1066_v1 = vadd.f32 %v1062_v12, %v1699_v62 }
0x114b   :  { %v1067_v10 = vadd.f32 %v1063_v8, %v1693_v56 }
0x114c   :  { %v1142_v19 = vmul.f32 -1.442695, %v1066_v1 }
0x114d   :  { %1382 = vtanh.f32 %v1067_v10  ;;  %v1143_v0 = vmul.f32 -1.442695, %v1067_v10 }
0x114e   :  { %1384 = vpow2.f32 %v1142_v19 }
0x1157   :  { %v1383_v11 = vpop.eup %1382 }
0x1158   :  { %1086 = vrot.lane.b32.xlu1 %v1383_v11, %s1496_s26  ;;  %v1385_v14 = vpop.eup %1384 }
0x1159   :  { %v1074_v15 = vadd.f32 1.0, %v1385_v14 }
0x115b   :  { %1386 = vrcp.f32 %v1074_v15 }
0x1165   :  { %v1387_v16 = vpop.eup %1386 }
0x1166   :  { %v1084_v23 = vmul.f32 %v1387_v16, %v1082_v21 }
0x11ca   :  { %v1087_v17 = vpop.permute.xlu1 %1086 }
0x11cb   :  { %v1089_v18 = vmul.f32 %v1387_v16, %v1087_v17 }
0x11cd   :  { %1091 = vrot.lane.b32.xlu0 %v1089_v18, %s1496_s26 }
0x123f   :  { %v1092_v56 = vpop.permute.xlu0 %1091 }
0x1240   :  { %v1094_v24 = vadd.f32 %v1092_v56, %v1084_v23 }
0x1242   :  { %1388 = vtanh.f32 %v1094_v24 }
0x1243   :  { %1390 = vpow2.f32 %v1143_v0 }
0x124c   :  { %v1389_v13 = vpop.eup %1388 }
0x124d   :  { %1097 = vrot.lane.b32.xlu1 %v1389_v13, %s1496_s26  ;;  %v1391_v62 = vpop.eup %1390 }
0x124e   :  { %v1075_v22 = vadd.f32 1.0, %v1391_v62 }
0x1250   :  { %1392 = vrcp.f32 %v1075_v22 }
0x125a   :  { %v1393_v26 = vpop.eup %1392 }
0x12bf   :  { %v1098_v35 = vpop.permute.xlu1 %1097 }
0x12c0   :  { %v1100_v39 = vmul.f32 %v1393_v26, %v1098_v35 }
0x12c2   :  { %1102 = vst.msk [vmem:[#allocation8 - $0x6] sm:$0xc0] %vm1101_vm1, %v1100_v39 }
0x12c3   :  { %1471 = shalt.err (!%p1468_p0)
}
0x12c4   :  { %s1472_s7 = scalar_lea.hbm %s1746_s4, 32 }
0x12c5   :  { %p1473_p1 = scmp.ne.s32.totalorder %s1746_s4, %s1472_s7  ;;  %p1476_p2 = scmp.lt.u32.totalorder %s1472_s7, %s1746_s4 }
0x12c7   :  { %p1478_p3 = pnand %p1476_p2, %p1473_p1 }
0x12c9   :  { %1481 = shalt.err (!%p1478_p3)
}
0x12ca   :  { %1112 = dma.vmem_to_hbm [thread:$0]  %s1110_s29, 32, %s1746_s4, [#allocation4]  }
0x12cb   :  { %1486 = dma.done.wait [#allocation4], 32  }
0x12cc   :  { %1487 = vsyncadd [#allocation4], 4294967264 }
0x12cd   :  { %1116 = vsyncpa [#allocation3], 1 }
0x12ce   :  { %1117 = vsyncpa [#allocation6], 1 }
0x12cf   :  { %1118 = vsyncpa [#allocation4], 1 }

</bundles_post_ra>
